<compile_context>
chip_gen: v6e
topology: v6e:2x2x1
jax: 0.10.0
libtpu: 0.0.40
codegen_flags: <defaults>
</compile_context>

<pallas_src>
import functools

import jax
import jax.numpy as jnp
from jax.experimental import pallas as pl
from jax.experimental.pallas import tpu as pltpu

LANE = 128
VMEM_LIMIT = 64 * 1024 * 1024  # raise the scoped VMEM limit (v5e default is 16 MiB)


def _round_up(x, m):
    return ((x + m - 1) // m) * m


# ----------------------------- Pallas kernels -------------------------------

def _matmul_bn_kernel(x_ref, w_ref, scale_ref, bias_ref, o_ref, acc_ref, *, relu):
    """(tile_m, tile_k) @ (tile_k, N), K-tiled reduction into f32 scratch."""
    k = pl.program_id(1)

    @pl.when(k == 0)
    def _():
        acc_ref[...] = jnp.zeros_like(acc_ref)

    acc_ref[...] += jnp.dot(x_ref[...], w_ref[...],
                            preferred_element_type=jnp.float32)

    @pl.when(k == pl.num_programs(1) - 1)
    def _():
        y = acc_ref[...] * scale_ref[...] + bias_ref[...]
        if relu:
            y = jnp.maximum(y, 0.0)
        o_ref[...] = y.astype(o_ref.dtype)


def _conv3x3_bn_relu_kernel(x_ref, w_ref, scale_ref, bias_ref, o_ref,
                            *, stride, tile_ho, wo):
    """3x3 conv via 9 in-kernel tap matmuls over a VMEM-resident padded image."""
    i = pl.program_id(1)
    cin = x_ref.shape[-1]
    cout = o_ref.shape[-1]
    r0 = i * tile_ho * stride

    acc = jnp.zeros((tile_ho * wo, cout), jnp.float32)
    for kh in range(3):
        for kw in range(3):
            if stride == 1:
                patch = x_ref[pl.ds(r0 + kh, tile_ho), pl.ds(kw, wo), :]
            else:
                patch = x_ref[pl.ds(r0 + kh, tile_ho, stride=stride),
                              pl.ds(kw, wo, stride=stride), :]
            acc = acc + jnp.dot(patch.reshape(tile_ho * wo, cin),
                                w_ref[kh * 3 + kw],
                                preferred_element_type=jnp.float32)

    y = acc * scale_ref[...] + bias_ref[...]
    y = jnp.maximum(y, 0.0)
    o_ref[...] = y.reshape(tile_ho, wo, cout).astype(o_ref.dtype)


def _conv3_shortcut_kernel(x_ref, w_ref, s_ref, b_ref,
                           xs_ref, wsc_ref, ssc_ref, bsc_ref, o_ref):
    """conv3 matmul + BN3 + (shortcut 1x1 matmul + BN) + residual add + ReLU."""
    main = jnp.dot(x_ref[...], w_ref[...], preferred_element_type=jnp.float32)
    main = main * s_ref[...] + b_ref[...]
    res = jnp.dot(xs_ref[...], wsc_ref[...], preferred_element_type=jnp.float32)
    res = res * ssc_ref[...] + bsc_ref[...]
    o_ref[...] = jnp.maximum(main + res, 0.0).astype(o_ref.dtype)


def _conv3_identity_kernel(x_ref, w_ref, s_ref, b_ref, res_ref, o_ref):
    """conv3 matmul + BN3 + identity residual add + ReLU."""
    main = jnp.dot(x_ref[...], w_ref[...], preferred_element_type=jnp.float32)
    main = main * s_ref[...] + b_ref[...]
    o_ref[...] = jnp.maximum(main + res_ref[...].astype(jnp.float32),
                             0.0).astype(o_ref.dtype)


# ------------------------------ tiling helpers -------------------------------

def _pick_tile_m(m):
    # Largest tile giving >=2 grid steps (keeps both v7x TensorCores busy),
    # capped at 512 for good HBM-roofline utilisation.
    for t in (512, 256, 128, 64, 32, 16, 8):
        if m >= 2 * t:
            return t
    return _round_up(m, 8)


def _pick_tile_k(k):
    for t in (512, 256, 128):
        if k % t == 0:
            return t
    return k


def _pick_tile_rows(ho, wo, target=256):
    best = 1
    for t in range(1, ho + 1):
        if ho % t == 0 and t * wo <= max(target, wo):
            best = t
    return best


# ------------------------------ kernel wrappers -------------------------------

def matmul_bn(x2d, w, scale, bias, *, relu, out_dtype=jnp.float32):
    """(M, K) @ (K, N) with fused folded-BN affine (+ optional ReLU), K-tiled."""
    M, K = x2d.shape
    N = w.shape[1]
    tile_m = _pick_tile_m(M)
    m_pad = _round_up(M, tile_m)
    if m_pad != M:
        x2d = jnp.pad(x2d, ((0, m_pad - M), (0, 0)))
    tile_k = _pick_tile_k(K)
    grid = (m_pad // tile_m, K // tile_k)

    out = pl.pallas_call(
        functools.partial(_matmul_bn_kernel, relu=relu),
        out_shape=jax.ShapeDtypeStruct((m_pad, N), out_dtype),
        grid=grid,
        in_specs=[
            pl.BlockSpec((tile_m, tile_k), lambda i, k: (i, k)),
            pl.BlockSpec((tile_k, N), lambda i, k: (k, 0)),
            pl.BlockSpec((1, N), lambda i, k: (0, 0)),
            pl.BlockSpec((1, N), lambda i, k: (0, 0)),
        ],
        out_specs=pl.BlockSpec((tile_m, N), lambda i, k: (i, 0)),
        scratch_shapes=[pltpu.VMEM((tile_m, N), jnp.float32)],
        compiler_params=pltpu.CompilerParams(
            dimension_semantics=("parallel", "arbitrary"),
            vmem_limit_bytes=VMEM_LIMIT),
    )(x2d, w, scale, bias)
    return out[:M] if m_pad != M else out


def conv3x3_bn_relu(x_nhwc, w_taps, scale, bias, *, stride):
    """Fused 3x3 conv (pad=1) + folded BN + ReLU.  x: (N,H,W,C) bf16."""
    n, h, w, c = x_nhwc.shape
    cout = w_taps.shape[-1]
    ho = (h + 2 - 3) // stride + 1
    wo = (w + 2 - 3) // stride + 1
    xp = jnp.pad(x_nhwc, ((0, 0), (1, 1), (1, 1), (0, 0)))
    hp, wp = h + 2, w + 2
    tile_ho = _pick_tile_rows(ho, wo)
    grid = (n, ho // tile_ho)

    kern = functools.partial(_conv3x3_bn_relu_kernel,
                             stride=stride, tile_ho=tile_ho, wo=wo)
    return pl.pallas_call(
        kern,
        out_shape=jax.ShapeDtypeStruct((n, ho, wo, cout), jnp.bfloat16),
        grid=grid,
        in_specs=[
            pl.BlockSpec((None, hp, wp, c), lambda b, i: (b, 0, 0, 0)),
            pl.BlockSpec((9, c, cout), lambda b, i: (0, 0, 0)),
            pl.BlockSpec((1, cout), lambda b, i: (0, 0)),
            pl.BlockSpec((1, cout), lambda b, i: (0, 0)),
        ],
        out_specs=pl.BlockSpec((None, tile_ho, wo, cout),
                               lambda b, i: (b, i, 0, 0)),
        compiler_params=pltpu.CompilerParams(
            dimension_semantics=("parallel", "parallel"),
            vmem_limit_bytes=VMEM_LIMIT),
    )(xp, w_taps, scale, bias)


def matmul_bn_shortcut(x2d, w, scale, bias, xs2d, wsc, ssc, bsc):
    """Fused conv3 + BN3 + shortcut(conv+BN) + residual + final ReLU."""
    M, K = x2d.shape
    Ks = xs2d.shape[1]
    N = w.shape[1]
    tile_m = _pick_tile_m(M)
    m_pad = _round_up(M, tile_m)
    if m_pad != M:
        x2d = jnp.pad(x2d, ((0, m_pad - M), (0, 0)))
        xs2d = jnp.pad(xs2d, ((0, m_pad - M), (0, 0)))
    grid = (m_pad // tile_m,)

    out = pl.pallas_call(
        _conv3_shortcut_kernel,
        out_shape=jax.ShapeDtypeStruct((m_pad, N), jnp.float32),
        grid=grid,
        in_specs=[
            pl.BlockSpec((tile_m, K), lambda i: (i, 0)),
            pl.BlockSpec((K, N), lambda i: (0, 0)),
            pl.BlockSpec((1, N), lambda i: (0, 0)),
            pl.BlockSpec((1, N), lambda i: (0, 0)),
            pl.BlockSpec((tile_m, Ks), lambda i: (i, 0)),
            pl.BlockSpec((Ks, N), lambda i: (0, 0)),
            pl.BlockSpec((1, N), lambda i: (0, 0)),
            pl.BlockSpec((1, N), lambda i: (0, 0)),
        ],
        out_specs=pl.BlockSpec((tile_m, N), lambda i: (i, 0)),
        compiler_params=pltpu.CompilerParams(
            dimension_semantics=("parallel",),
            vmem_limit_bytes=VMEM_LIMIT),
    )(x2d, w, scale, bias, xs2d, wsc, ssc, bsc)
    return out[:M] if m_pad != M else out


def matmul_bn_add_relu(x2d, w, scale, bias, res2d):
    """Fused conv3 + BN3 + identity residual + final ReLU."""
    M, K = x2d.shape
    N = w.shape[1]
    tile_m = _pick_tile_m(M)
    m_pad = _round_up(M, tile_m)
    if m_pad != M:
        x2d = jnp.pad(x2d, ((0, m_pad - M), (0, 0)))
        res2d = jnp.pad(res2d, ((0, m_pad - M), (0, 0)))
    grid = (m_pad // tile_m,)

    out = pl.pallas_call(
        _conv3_identity_kernel,
        out_shape=jax.ShapeDtypeStruct((m_pad, N), jnp.float32),
        grid=grid,
        in_specs=[
            pl.BlockSpec((tile_m, K), lambda i: (i, 0)),
            pl.BlockSpec((K, N), lambda i: (0, 0)),
            pl.BlockSpec((1, N), lambda i: (0, 0)),
            pl.BlockSpec((1, N), lambda i: (0, 0)),
            pl.BlockSpec((tile_m, N), lambda i: (i, 0)),
        ],
        out_specs=pl.BlockSpec((tile_m, N), lambda i: (i, 0)),
        compiler_params=pltpu.CompilerParams(
            dimension_semantics=("parallel",),
            vmem_limit_bytes=VMEM_LIMIT),
    )(x2d, w, scale, bias, res2d)
    return out[:M] if m_pad != M else out


# ------------------------------ glue (JAX) ----------------------------------

def _fold_bn_padded(bn, c_pad, eps=1e-5):
    scale = bn["gamma"] / jnp.sqrt(bn["var"] + eps)
    bias = bn["beta"] - bn["mean"] * scale
    c = scale.shape[0]
    scale = jnp.pad(scale, (0, c_pad - c)).reshape(1, c_pad).astype(jnp.float32)
    bias = jnp.pad(bias, (0, c_pad - c)).reshape(1, c_pad).astype(jnp.float32)
    return scale, bias


def _pad2d(a, rows, cols):
    return jnp.pad(a, ((0, rows - a.shape[0]), (0, cols - a.shape[1])))


def init_bottleneck_params(key, in_planes, planes, stride, expansion=4):
    out_planes = expansion * planes
    ks = jax.random.split(key, 24)   # enough subkeys for all branches
    k = iter(ks)

    def rnd(shape, s=0.1):
        return s * jax.random.normal(next(k), shape, jnp.float32)

    def bn(c):
        return dict(gamma=1.0 + rnd((c,)), beta=rnd((c,)),
                    mean=rnd((c,)), var=0.5 + jnp.abs(rnd((c,))))

    p = dict(
        conv1_w=rnd((planes, in_planes, 1, 1)),        # PyTorch OIHW
        bn1=bn(planes),
        conv2_w=rnd((planes, planes, 3, 3)),
        bn2=bn(planes),
        conv3_w=rnd((out_planes, planes, 1, 1)),
        bn3=bn(out_planes),
    )
    p["has_shortcut"] = (stride != 1) or (in_planes != out_planes)
    if p["has_shortcut"]:
        p["sc_w"] = rnd((out_planes, in_planes, 1, 1))
        p["sc_bn"] = bn(out_planes)
    return p


def bottleneck_forward(x_nchw, params, stride):
    """Matches Bottleneck.forward (eval-mode BN). Input/output NCHW float32."""
    n, cin, h, w = x_nchw.shape
    planes = params["conv1_w"].shape[0]
    out_planes = params["conv3_w"].shape[0]

    cin_p = _round_up(cin, LANE)       # lane-dense channel padding
    pln_p = _round_up(planes, LANE)
    co_p = _round_up(out_planes, LANE)

    # NHWC, channel-pad, bf16 feed for the MXU.
    x = jnp.transpose(x_nchw, (0, 2, 3, 1))                     # (N,H,W,Cin)
    x = jnp.pad(x, ((0, 0), (0, 0), (0, 0), (0, cin_p - cin)))
    x_bf = x.astype(jnp.bfloat16)

    # --- conv1 (1x1) + bn1 + relu ---
    w1 = _pad2d(params["conv1_w"][:, :, 0, 0].T, cin_p, pln_p).astype(jnp.bfloat16)
    s1, b1 = _fold_bn_padded(params["bn1"], pln_p)
    out1 = matmul_bn(x_bf.reshape(n * h * w, cin_p), w1, s1, b1,
                     relu=True, out_dtype=jnp.bfloat16)
    out1 = out1.reshape(n, h, w, pln_p)

    # --- conv2 (3x3, stride, pad=1) + bn2 + relu: in-kernel 9-tap accumulation ---
    w2 = jnp.transpose(params["conv2_w"], (2, 3, 1, 0)).reshape(9, planes, planes)
    w2 = jnp.pad(w2, ((0, 0), (0, pln_p - planes), (0, pln_p - planes))
                 ).astype(jnp.bfloat16)
    s2, b2 = _fold_bn_padded(params["bn2"], pln_p)
    out2 = conv3x3_bn_relu(out1, w2, s2, b2, stride=stride)     # (N,Ho,Wo,pln_p) bf16
    _, ho, wo, _ = out2.shape
    out2_2d = out2.reshape(n * ho * wo, pln_p)

    # --- conv3 (1x1) + bn3 + shortcut + residual + final relu (fully fused) ---
    w3 = _pad2d(params["conv3_w"][:, :, 0, 0].T, pln_p, co_p).astype(jnp.bfloat16)
    s3, b3 = _fold_bn_padded(params["bn3"], co_p)

    if params["has_shortcut"]:
        # TODO(synk): stride>1 spatial subsampling of the shortcut input is done
        #             with an XLA slice here rather than in-kernel strided DMA.
        xs = x_bf[:, ::stride, ::stride, :].reshape(n * ho * wo, cin_p)
        wsc = _pad2d(params["sc_w"][:, :, 0, 0].T, cin_p, co_p).astype(jnp.bfloat16)
        ssc, bsc = _fold_bn_padded(params["sc_bn"], co_p)
        out = matmul_bn_shortcut(out2_2d, w3, s3, b3, xs, wsc, ssc, bsc)
    else:
        # identity shortcut: stride == 1 and cin == out_planes (so cin_p == co_p)
        res = x.reshape(n * h * w, cin_p)
        out = matmul_bn_add_relu(out2_2d, w3, s3, b3, res)

    out = out.reshape(n, ho, wo, co_p)[..., :out_planes]
    return jnp.transpose(out, (0, 3, 1, 2))                     # back to NCHW, f32


# --------------------------------- main --------------------------------------

if __name__ == "__main__":
    key = jax.random.PRNGKey(0)
    kx, kp = jax.random.split(key)

    # Small shapes consistent with the module: batch=2, in_planes=4, planes=4, 16x16.
    batch, in_planes, planes, stride = 2, 4, 4, 1
    H = W = 16
    x = jax.random.normal(kx, (batch, in_planes, H, W), jnp.float32)

    params = init_bottleneck_params(kp, in_planes, planes, stride)

    out = bottleneck_forward(x, params, stride)
    jax.block_until_ready(out)

    expansion = 4
    ho = (H + 2 - 3) // stride + 1
    assert out.shape == (batch, expansion * planes, ho, ho), out.shape
    assert bool(jnp.all(out >= 0.0))  # final ReLU
    print("KERNEL_OK")
</pallas_src>

<mosaic_0001>
module attributes {stable_mosaic.version = 11 : i64} {
  func.func @_matmul_bn_kernel(%arg0: i32, %arg1: i32, %arg2: memref<256x128xbf16, #tpu.memory_space<vmem>>, %arg3: memref<128x128xbf16, #tpu.memory_space<vmem>>, %arg4: memref<1x128xf32, #tpu.memory_space<vmem>>, %arg5: memref<1x128xf32, #tpu.memory_space<vmem>>, %arg6: memref<256x128xbf16, #tpu.memory_space<vmem>>, %arg7: memref<256x128xf32, #tpu.memory_space<vmem>>) attributes {dimension_semantics = [#tpu.dimension_semantics<parallel>, #tpu.dimension_semantics<arbitrary>], iteration_bounds = array<i64: 2, 1>, scalar_prefetch = 0 : i64, scratch_operands = 1 : i64, tpu.core_type = #tpu.core_type<tc>, window_params = [{transform_indices = @transform_0, window_bounds = array<i64: 256, 128>}, {transform_indices = @transform_1, window_bounds = array<i64: 128, 128>}, {pipeline_mode = #tpu.pipeline_mode<synchronous>, transform_indices = @transform_2, window_bounds = array<i64: 1, 128>}, {pipeline_mode = #tpu.pipeline_mode<synchronous>, transform_indices = @transform_3, window_bounds = array<i64: 1, 128>}, {transform_indices = @transform_4, window_bounds = array<i64: 256, 128>}]} {
    %c0_i32 = arith.constant 0 : i32
    %0 = arith.cmpi eq, %arg1, %c0_i32 : i32
    %1 = arith.extui %0 : i1 to i32
    %c0_i32_0 = arith.constant 0 : i32
    %2 = arith.cmpi ne, %1, %c0_i32_0 : i32
    scf.if %2 {
      %cst_10 = arith.constant 0.000000e+00 : f32
      %12 = vector.broadcast %cst_10 : f32 to vector<256x128xf32>
      %c0_11 = arith.constant 0 : index
      %c0_12 = arith.constant 0 : index
      %13 = vector.load %arg7[%c0_11, %c0_12] : memref<256x128xf32, #tpu.memory_space<vmem>>, vector<256x128xf32>
      tpu.vector_store %arg7[%c0_11, %c0_12], %12 {strides = array<i32>} : memref<256x128xf32, #tpu.memory_space<vmem>>, vector<256x128xf32>,
    } else {
    }
    %c0 = arith.constant 0 : index
    %c0_1 = arith.constant 0 : index
    %3 = vector.load %arg7[%c0, %c0_1] : memref<256x128xf32, #tpu.memory_space<vmem>>, vector<256x128xf32>
    %c0_2 = arith.constant 0 : index
    %c0_3 = arith.constant 0 : index
    %4 = vector.load %arg2[%c0_2, %c0_3] : memref<256x128xbf16, #tpu.memory_space<vmem>>, vector<256x128xbf16>
    %c0_4 = arith.constant 0 : index
    %c0_5 = arith.constant 0 : index
    %5 = vector.load %arg3[%c0_4, %c0_5] : memref<128x128xbf16, #tpu.memory_space<vmem>>, vector<128x128xbf16>
    %cst = arith.constant dense<0.000000e+00> : vector<256x128xf32>
    %6 = tpu.matmul %4, %5, %cst {dimension_numbers = #tpu.dot_dimension_numbers<[1], [0], [0], [1], [0, 0, 1, 1], [], []>} : vector<256x128xbf16>, vector<128x128xbf16>, vector<256x128xf32> -> vector<256x128xf32>
    %7 = arith.addf %3, %6 : vector<256x128xf32>
    %c0_6 = arith.constant 0 : index
    %c0_7 = arith.constant 0 : index
    %8 = vector.load %arg7[%c0_6, %c0_7] : memref<256x128xf32, #tpu.memory_space<vmem>>, vector<256x128xf32>
    tpu.vector_store %arg7[%c0_6, %c0_7], %7 {strides = array<i32>} : memref<256x128xf32, #tpu.memory_space<vmem>>, vector<256x128xf32>,
    %c0_i32_8 = arith.constant 0 : i32
    %9 = arith.cmpi eq, %arg1, %c0_i32_8 : i32
    %10 = arith.extui %9 : i1 to i32
    %c0_i32_9 = arith.constant 0 : i32
    %11 = arith.cmpi ne, %10, %c0_i32_9 : i32
    scf.if %11 {
      %c0_10 = arith.constant 0 : index
      %c0_11 = arith.constant 0 : index
      %12 = vector.load %arg7[%c0_10, %c0_11] : memref<256x128xf32, #tpu.memory_space<vmem>>, vector<256x128xf32>
      %c0_12 = arith.constant 0 : index
      %c0_13 = arith.constant 0 : index
      %13 = vector.load %arg4[%c0_12, %c0_13] : memref<1x128xf32, #tpu.memory_space<vmem>>, vector<1x128xf32>
      %14 = vector.broadcast %13 : vector<1x128xf32> to vector<256x128xf32>
      %15 = arith.mulf %12, %14 : vector<256x128xf32>
      %c0_14 = arith.constant 0 : index
      %c0_15 = arith.constant 0 : index
      %16 = vector.load %arg5[%c0_14, %c0_15] : memref<1x128xf32, #tpu.memory_space<vmem>>, vector<1x128xf32>
      %17 = vector.broadcast %16 : vector<1x128xf32> to vector<256x128xf32>
      %18 = arith.addf %15, %17 : vector<256x128xf32>
      %cst_16 = arith.constant 0.000000e+00 : f32
      %19 = vector.broadcast %cst_16 : f32 to vector<256x128xf32>
      %20 = arith.maximumf %18, %19 : vector<256x128xf32>
      %21 = arith.truncf %20 : vector<256x128xf32> to vector<256x128xbf16>
      %c0_17 = arith.constant 0 : index
      %c0_18 = arith.constant 0 : index
      %22 = vector.load %arg6[%c0_17, %c0_18] : memref<256x128xbf16, #tpu.memory_space<vmem>>, vector<256x128xbf16>
      tpu.vector_store %arg6[%c0_17, %c0_18], %21 {strides = array<i32>} : memref<256x128xbf16, #tpu.memory_space<vmem>>, vector<256x128xbf16>,
    } else {
    }
    return
  }
  func.func @transform_0(%arg0: i32, %arg1: i32) -> (i32, i32) {
    %c0_i32 = arith.constant 0 : i32
    return %arg0, %arg1 : i32, i32
  }
  func.func @transform_1(%arg0: i32, %arg1: i32) -> (i32, i32) {
    %c0_i32 = arith.constant 0 : i32
    %c0_i32_0 = arith.constant 0 : i32
    return %arg1, %c0_i32 : i32, i32
  }
  func.func @transform_2(%arg0: i32, %arg1: i32) -> (i32, i32) {
    %c0_i32 = arith.constant 0 : i32
    %c0_i32_0 = arith.constant 0 : i32
    %c0_i32_1 = arith.constant 0 : i32
    return %c0_i32, %c0_i32_0 : i32, i32
  }
  func.func @transform_3(%arg0: i32, %arg1: i32) -> (i32, i32) {
    %c0_i32 = arith.constant 0 : i32
    %c0_i32_0 = arith.constant 0 : i32
    %c0_i32_1 = arith.constant 0 : i32
    return %c0_i32, %c0_i32_0 : i32, i32
  }
  func.func @transform_4(%arg0: i32, %arg1: i32) -> (i32, i32) {
    %c0_i32 = arith.constant 0 : i32
    %c0_i32_0 = arith.constant 0 : i32
    return %arg0, %c0_i32 : i32, i32
  }
}

</mosaic_0001>

<bundles_post_ra>
// kernel: tpu_custom_call.1
= control target key start
LH: loop header
LB: loop body
LE: loop exit
PB: predicated region body
PF: predicated region fallthrough
CT: control target
= control target key end

     0   :  { %s2024_s0 = inlined_call_operand.hbm [shape: bf16[512,128], index: 0, kind: input, shape index: {}]   ;;  %s2025_s1 = inlined_call_operand.hbm [shape: bf16[128,128], index: 1, kind: input, shape index: {}]   ;;  %s2026_s2 = inlined_call_operand.vmem [shape: f32[1,128], index: 2, kind: input, shape index: {}]   ;;  %s2027_s3 = inlined_call_operand.vmem [shape: f32[1,128], index: 3, kind: input, shape index: {}]   ;;  %s2028_s4 = inlined_call_operand.hbm [shape: bf16[512,128], index: 4, kind: output, shape index: {}]  }
   0x1   :  { %2032 = sst [smem:[#allocation12_spill]] %s2025_s1 }
   0x2   :  { %9 = vsyncpa [#allocation4], 0 }
   0x3   :  { %11 = vsyncpa [#allocation4 + $0x1], 0 }
   0x4   :  { %12 = vsyncpa [#allocation7], 0 }
   0x5   :  { %13 = vsyncpa [#allocation5], 0 }
   0x6   :  { %15 = vsyncpa [#allocation5 + $0x1], 0  ;;  %s1722_s15 = smov 0   ;;  %s1724_s16 = smov 0  }
   0x7   :  { %s1726_s17 = smov 0   ;;  %s1728_s18 = smov 0  }
   0x8   :  { %s1730_s19 = smov 0   ;;  %s1732_s20 = smov 0  }
   0x9 LB: > { %s1157_s21 = sadd.s32 4294967295, %s1688_s20   ;;  %s1158_s22 = sadd.s32 4294967294, %s1688_s20   ;;  %s1688_s20 = sphi %s1732_s20, %s21_s20   ;;  %s1684_s19 = sphi %s1730_s19, %s2052_s19   ;;  %s1680_s18 = sphi %s1728_s18, %s2051_s18   ;;  %s1676_s17 = sphi %s1726_s17, %s2050_s17   ;;  %s1672_s16 = sphi %s1724_s16, %s2049_s16   ;;  %s1668_s15 = sphi %s1722_s15, %s2048_s15  }
   0xa   : > { %p55_p0 = scmp.ne.s32.totalorder %s1672_s16, %s1668_s15  ;;  %p1756_p1 = scmp.eq.s32.totalorder %s1157_s21, 0 }
   0xb   : > { %p1760_p2 = scmp.eq.s32.totalorder %s1157_s21, 1  ;;  %p153_p3 = scmp.eq.s32.totalorder %s1158_s22, 1 }
   0xc   : > { %p1766_p4 = por %p1756_p1, %p55_p0  ;;  %p1159_p5 = scmp.ge.s32.totalorder %s1688_s20, 1 }
   0xd   : > { %p1771_p6 = por %p153_p3, %p55_p0  ;;  %p160_p7 = scmp.lt.s32.totalorder %s1688_s20, 3 }
   0xe   : > { %s2035_s25 = scalar_select %p1766_p4, 1, 0 }
   0xf   : > { %s2036_s26 = scalar_select %p1771_p6, 1, 0 }
  0x10   : > { %p1776_p8 = pnand %p1159_p5, %p160_p7  ;;  %s1690_s28 = smov [#allocation6]  }
  0x11   : > { %s175_s29 = sshll.u32 %s1690_s28, 4  ;;  %s33_s5 = sadd.s32 1, %s1684_s19  ;;  %s176_s29 = int_to_ptr.vmem [resolvable:$true] %s175_s29 }
  0x12   : > { %p1457_p9 = pneg %p1776_p8  ;;  %s1561_s6 = scalar_lea.vmem %s176_s29, 1024 }
  0x13   : > { %p1562_p13 = scmp.ne.s32.totalorder %s176_s29, %s1561_s6  ;;  %p1569_p5 = scmp.lt.s32.totalorder %s176_s29, %s176_s29 }
  0x14   : > { %p1785_p11 = pnand %p1457_p9, %p1756_p1  ;;  %p1570_p7 = scmp.lt.s32.totalorder %s1561_s6, %s1561_s6 }
  0x16   : > { %p1552_p12 = pneg %p1785_p11  ;;  %p1571_p6 = por %p1570_p7, %p1569_p5 }
  0x18   : > { %p1564_p0 = pnand %p1562_p13, %p1552_p12 }
  0x1a   : > { %p1565_p3 = pneg %p1564_p0 }
  0x1c   : > { %p1572_p4 = pnand %p1571_p6, %p1565_p3 }
  0x1e   : > { %1575 = shalt.err (!%p1572_p4)
}
  0x1f   : > { %s2030_s7 = smov 64   ;;  %s2031_s8 = smov 4  }
  0x20   : > { %s2039_s1 = sld [smem:[#allocation12_spill]]  ;;  %p35_p4 = scmp.ge.s32.totalorder %s33_s5, 2 }
  0x21   : > { %s42_s11 = sadd.s32 1, %s1676_s17  ;;  %p49_p6 = scmp.ne.s32.totalorder %s1676_s17, %s1672_s16 }
  0x22   : > { %p50_p9 = scmp.eq.s32.totalorder %s1688_s20, 0  ;;  %s2054_s5 = smov (%p35_p4, %s33_s5), 0 }
  0x23   : > { %p1812_p13 = por %p1760_p2, %p49_p6  ;;  %s37_s14 = ssub.s32 %s1684_s19, %s2054_s5 }
  0x24   : > { %p1806_p12 = por %p50_p9, %p49_p6  ;;  %p1470_p0 = scmp.lt.s32.totalorder %s1688_s20, 2 }
  0x25   : > { %s195_s21 = sand.u32 1, %s1676_s17  }
  0x26   : > { %1460 = dma.hbm_to_vmem [thread:$0]  (!%p1785_p11), %s2039_s1, 1024, %s176_s29, [#allocation7], %s2030_s7, %s2030_s7, %s2031_s8  }
  0x27   : > { %p40_p11 = scmp.eq.s32.totalorder %s37_s14, 0  ;;  %s1162_s22 = sshll.u32 %s195_s21, 7 }
  0x28   : > { %s1232_s29 = sshll.u32 %s1684_s19, 11  ;;  %s199_s10 = scalar_lea.vmem [#allocation3], %s1162_s22 }
  0x29   : > { %s1821_s28 = scalar_select %p40_p11, %s1676_s17, %s42_s11  }
  0x2a   : > { %s206_s9 = scalar_lea.hbm %s2024_s0, %s1232_s29  ;;  %s207_s7 = sshll.u32 %s199_s10, 4  ;;  %s208_s7 = int_to_ptr.vmem [resolvable:$true] %s207_s7 }
  0x2b   : > { %p1829_p2 = pnand %p1470_p0, %p1806_p12  ;;  %s196_s8 = scalar_lea.sflag [#allocation4], %s195_s21 }
  0x2c   : > { %s1589_s14 = scalar_lea.vmem %s208_s7, 2048  ;;  %s1693_s11 = smov [#allocation3]  }
  0x2d   : > { %p1578_p3 = pneg %p1829_p2  ;;  %p1590_p5 = scmp.ne.s32.totalorder %s208_s7, %s1589_s14 }
  0x2e   : > { %s1594_s1 = sshll.u32 %s1693_s11, 4  ;;  %s1595_s1 = int_to_ptr.vmem [resolvable:$false] %s1594_s1 }
  0x2f   : > { %p1592_p7 = pnand %p1590_p5, %p1578_p3  ;;  %s1596_s29 = scalar_lea.vmem %s1595_s1, 4096 }
  0x30   : > { %p1597_p6 = scmp.lt.s32.totalorder %s208_s7, %s1595_s1  ;;  %p1598_p9 = scmp.lt.s32.totalorder %s1596_s29, %s1589_s14 }
  0x31   : > { %p1593_p4 = pneg %p1592_p7 }
  0x32   : > { %p1599_p11 = por %p1598_p9, %p1597_p6 }
  0x34   : > { %p1600_p10 = pnand %p1599_p11, %p1593_p4 }
  0x36   : > { %1603 = shalt.err (!%p1600_p10)
}
  0x37   : > { %s2043_s12 = smov 4   ;;  %s2044_s22 = smov 64  }
  0x38   : > { %1464 = dma.hbm_to_vmem [thread:$0]  (!%p1829_p2), %s206_s9, 2048, %s208_s7, %s196_s8, %s2044_s22, %s2044_s22, %s2043_s12  }
  0x39   : > { %219 = sbr.rel (%p1776_p8) target bundleno = 343 (0x157), region = 36  ;;  %s1843_s21 = sand.u32 (!%p1776_p8), 1, %s1672_s16  }
  0x3a   : > { %s1166_s1 = sshll.u32 (!%p1776_p8), %s1843_s21, 7  ;;  %s222_s30 = scalar_lea.sflag (!%p1776_p8), [#allocation4], %s1843_s21 }
  0x3b   : > { %s1849_s6 = scalar_lea.vmem (!%p1776_p8), [#allocation3], %s1166_s1  ;;  %p2045_p10 = scmp.ne.s32.totalorder (!%p1776_p8), %s2035_s25, 0 }
  0x3e   : > { %1655 = dma.done.wait (%p2045_p10), %s222_s30, 2048  }
  0x3f   : > { %1657 = vsyncadd (%p2045_p10), %s222_s30, 4294965248 }
  0x40   : > { %1659 = dma.done.wait (%p1756_p1), [#allocation7], 1024  }
  0x41   : > { %1661 = vsyncadd (%p1756_p1), [#allocation7], 4294966272  ;;  %v1526_v0 = vld [vmem:[#allocation6 + $0x38] sm:$0xff]   ;;  %v1527_v1 = vld [vmem:[#allocation6 + $0x30] sm:$0xff]   ;;  %s1907_s8 = scalar_lea.vmem [#allocation8], %s1166_s1  ;;  %s1265_s9 = sshll.u32 %s1680_s18, 11 }
  0x42   : > { %1385 = vmatprep.subr.bf16.mxu0 %v1526_v0  ;;  %1433 = vmatprep.subr.bf16.mxu1 %v1526_v0  ;;  %v1528_v2 = vld [vmem:[#allocation6 + $0x28] sm:$0xff]   ;;  %v1529_v3 = vld [vmem:[#allocation6 + $0x20] sm:$0xff]   ;;  %v1530_v6 = vld [vmem:[#allocation6 + $0x18] sm:$0xff]   ;;  %s1062_s10 = sshll.u32 %s1907_s8, 4  ;;  %s1970_s18 = scalar_lea.hbm %s2028_s4, %s1265_s9  ;;  %s1972_s10 = int_to_ptr.vmem [resolvable:$true] %s1062_s10 }
  0x43   : > { %1386 = vmatpush3.bf16.msra.mxu0 %v1526_v0  ;;  %1441 = vmatpush3.bf16.msra.mxu1 %v1526_v0  ;;  %v1534_v4 = vld [vmem:[%s1849_s6] sm:$0xff]   ;;  %v1531_v7 = vld [vmem:[#allocation6 + $0x10] sm:$0xff]   ;;  %v1532_v8 = vld [vmem:[#allocation6 + $0x8] sm:$0xff]   ;;  %s1049_s11 = scalar_lea.sflag [#allocation5], %s1843_s21  ;;  %s1604_s29 = scalar_lea.vmem %s1972_s10, 2048 }
  0x44   : > { %1387 = vmatprep.subr.bf16.mxu0 %v1527_v1  ;;  %1434 = vmatprep.subr.bf16.mxu1 %v1527_v1  ;;  %v1535_v5 = vld [vmem:[%s1849_s6 + $0x40] sm:$0xff]   ;;  %v1536_v10 = vld [vmem:[%s1849_s6 + $0x8] sm:$0xff]   ;;  %v1538_v12 = vld [vmem:[%s1849_s6 + $0x10] sm:$0xff]   ;;  %p1605_p1 = scmp.ne.s32.totalorder %s1972_s10, %s1604_s29  ;;  %s1694_s12 = smov [#allocation8]  }
  0x45   : > { %1401 = vmatprep.mubr.bf16.mxu0 %v1534_v4  ;;  %1417 = vmatprep.mubr.bf16.mxu1 %v1535_v5  ;;  %v1533_v9 = vld [vmem:[#allocation6] sm:$0xff]   ;;  %v1537_v11 = vld [vmem:[%s1849_s6 + $0x48] sm:$0xff]   ;;  %v1539_v13 = vld [vmem:[%s1849_s6 + $0x50] sm:$0xff]   ;;  %s1608_s22 = sshll.u32 %s1694_s12, 4  ;;  %s1609_s22 = int_to_ptr.vmem [resolvable:$false] %s1608_s22 }
  0x46   : > { %v1540_v14 = vld [vmem:[%s1849_s6 + $0x18] sm:$0xff]   ;;  %v1542_v16 = vld [vmem:[%s1849_s6 + $0x20] sm:$0xff]   ;;  %v1544_v18 = vld [vmem:[%s1849_s6 + $0x28] sm:$0xff]   ;;  %p1606_p8 = pnand %p1605_p1, %p1812_p13  ;;  %s1610_s1 = scalar_lea.vmem %s1609_s22, 4096 }
  0x47   : > { %1388 = vmatpush3.bf16.msra.mxu0 %v1527_v1  ;;  %1442 = vmatpush3.bf16.msra.mxu1 %v1527_v1  ;;  %v1541_v15 = vld [vmem:[%s1849_s6 + $0x58] sm:$0xff]   ;;  %v1543_v17 = vld [vmem:[%s1849_s6 + $0x60] sm:$0xff]   ;;  %v1545_v19 = vld [vmem:[%s1849_s6 + $0x68] sm:$0xff]   ;;  %p1611_p0 = scmp.lt.s32.totalorder %s1972_s10, %s1609_s22  ;;  %p1612_p2 = scmp.lt.s32.totalorder %s1610_s1, %s1604_s29 }
  0x48   : > { %1389 = vmatprep.subr.bf16.mxu0 %v1528_v2  ;;  %1435 = vmatprep.subr.bf16.mxu1 %v1528_v2  ;;  %v1546_v20 = vld [vmem:[%s1849_s6 + $0x30] sm:$0xff]   ;;  %v1548_v22 = vld [vmem:[%s1849_s6 + $0x38] sm:$0xff]   ;;  %v1878_v24 = vld [vmem:[%s2026_s2] ss:$0 sm:$0xff]  ;;  %p1607_p12 = pneg %p1606_p8 }
  0x49   : > { %v1547_v21 = vld [vmem:[%s1849_s6 + $0x70] sm:$0xff]   ;;  %v1549_v23 = vld [vmem:[%s1849_s6 + $0x78] sm:$0xff]   ;;  %v1885_v29 = vld [vmem:[%s2027_s3] ss:$0 sm:$0xff]  ;;  %p1613_p3 = por %p1612_p2, %p1611_p0 }
  0x4b   : > { %1390 = vmatpush3.bf16.msra.mxu0 %v1528_v2  ;;  %1443 = vmatpush3.bf16.msra.mxu1 %v1528_v2  ;;  %p1614_p5 = pnand %p1613_p3, %p1607_p12 }
  0x4c   : > { %1391 = vmatprep.subr.bf16.mxu0 %v1529_v3  ;;  %1436 = vmatprep.subr.bf16.mxu1 %v1529_v3 }
  0x4f   : > { %1392 = vmatpush3.bf16.msra.mxu0 %v1529_v3  ;;  %1444 = vmatpush3.bf16.msra.mxu1 %v1529_v3 }
  0x50   : > { %1393 = vmatprep.subr.bf16.mxu0 %v1530_v6  ;;  %1437 = vmatprep.subr.bf16.mxu1 %v1530_v6 }
  0x53   : > { %1394 = vmatpush3.bf16.msra.mxu0 %v1530_v6  ;;  %1445 = vmatpush3.bf16.msra.mxu1 %v1530_v6 }
  0x54   : > { %1395 = vmatprep.subr.bf16.mxu0 %v1531_v7  ;;  %1438 = vmatprep.subr.bf16.mxu1 %v1531_v7 }
  0x57   : > { %1396 = vmatpush3.bf16.msra.mxu0 %v1531_v7  ;;  %1446 = vmatpush3.bf16.msra.mxu1 %v1531_v7 }
  0x58   : > { %1397 = vmatprep.subr.bf16.mxu0 %v1532_v8  ;;  %1439 = vmatprep.subr.bf16.mxu1 %v1532_v8 }
  0x5b   : > { %1398 = vmatpush3.bf16.msra.mxu0 %v1532_v8  ;;  %1447 = vmatpush3.bf16.msra.mxu1 %v1532_v8 }
  0x5c   : > { %1399 = vmatprep.subr.bf16.mxu0 %v1533_v9  ;;  %1440 = vmatprep.subr.bf16.mxu1 %v1533_v9 }
  0x5f   : > { %1400 = vmatpush3.bf16.msra.mxu0 %v1533_v9  ;;  %1448 = vmatpush3.bf16.msra.mxu1 %v1533_v9 }
  0x62   : > { %1402 = vmatmul.mubr.bf16.vlgmr.msra.gmra.mxu0 %v1536_v10  ;;  %1418 = vmatmul.mubr.bf16.vlgmr.msra.gmra.mxu1 %v1537_v11 }
  0x63   : > { %1405 = vmatprep.mubr.bf16.mxu0 %v1538_v12  ;;  %1421 = vmatprep.mubr.bf16.mxu1 %v1539_v13 }
  0x6a   : > { %1406 = vmatmul.mubr.bf16.gmra.mxu0 %v1540_v14  ;;  %1422 = vmatmul.mubr.bf16.gmra.mxu1 %v1541_v15 }
  0x6b   : > { %1409 = vmatprep.mubr.bf16.mxu0 %v1542_v16  ;;  %1425 = vmatprep.mubr.bf16.mxu1 %v1543_v17 }
  0x72   : > { %1410 = vmatmul.mubr.bf16.gmra.mxu0 %v1544_v18  ;;  %1426 = vmatmul.mubr.bf16.gmra.mxu1 %v1545_v19 }
  0x73   : > { %1413 = vmatprep.mubr.bf16.mxu0 %v1546_v20  ;;  %1429 = vmatprep.mubr.bf16.mxu1 %v1547_v21 }
  0x7a   : > { %1414 = vmatmul.mubr.bf16.gmra.mxu0 %v1548_v22  ;;  %1430 = vmatmul.mubr.bf16.gmra.mxu1 %v1549_v23 }
 0x122   : > { %v1403_v25 = vpop.f32.mrf.mxu0  ;;  %v1419_v26 = vpop.f32.mrf.mxu1 }
 0x123   : > { %v787_v27 = vmul.f32 %v1403_v25, %v1878_v24  ;;  %v803_v28 = vmul.f32 %v1419_v26, %v1878_v24 }
 0x124   : > { %v552_v30 = vpop.f32.mrf.mxu0  ;;  %v616_v31 = vpop.f32.mrf.mxu1 }
 0x125   : > { %v785_v32 = vmul.f32 %v1878_v24, %v552_v30  ;;  %v801_v33 = vmul.f32 %v1878_v24, %v616_v31  ;;  %v826_v36 = vadd.f32 %v1885_v29, %v787_v27  ;;  %v842_v37 = vadd.f32 %v1885_v29, %v803_v28 }
 0x126   : > { %v1404_v34 = vpop.f32.mrf.mxu0  ;;  %v1420_v35 = vpop.f32.mrf.mxu1 }
 0x127   : > { %v788_v38 = vmul.f32 %v1404_v34, %v1878_v24  ;;  %v804_v39 = vmul.f32 %v1420_v35, %v1878_v24  ;;  %v824_v42 = vadd.f32 %v1885_v29, %v785_v32  ;;  %v840_v43 = vadd.f32 %v1885_v29, %v801_v33 }
 0x128   : > { %v555_v40 = vpop.f32.mrf.mxu0  ;;  %v619_v41 = vpop.f32.mrf.mxu1  ;;  %v858_v50 = vmax.f32 %v826_v36, 0.0  ;;  %v874_v51 = vmax.f32 %v842_v37, 0.0 }
 0x129   : > { %v786_v44 = vmul.f32 %v1878_v24, %v555_v40  ;;  %v802_v45 = vmul.f32 %v1878_v24, %v619_v41  ;;  %v827_v46 = vadd.f32 %v1885_v29, %v788_v38  ;;  %v843_v47 = vadd.f32 %v1885_v29, %v804_v39 }
 0x12a   : > { %v1407_v48 = vpop.f32.mrf.mxu0  ;;  %v1423_v49 = vpop.f32.mrf.mxu1  ;;  %v856_v60 = vmax.f32 %v824_v42, 0.0  ;;  %v872_v61 = vmax.f32 %v840_v43, 0.0 }
 0x12b   : > { %v825_v52 = vadd.f32 %v1885_v29, %v786_v44  ;;  %v841_v53 = vadd.f32 %v1885_v29, %v802_v45  ;;  %v859_v54 = vmax.f32 %v827_v46, 0.0  ;;  %v875_v55 = vmax.f32 %v843_v47, 0.0 }
 0x12c   : > { %v791_v56 = vmul.f32 %v1407_v48, %v1878_v24  ;;  %v807_v57 = vmul.f32 %v1423_v49, %v1878_v24  ;;  %v568_v58 = vpop.f32.mrf.mxu0  ;;  %v632_v59 = vpop.f32.mrf.mxu1 }
 0x12d   : > { %v857_v62 = vmax.f32 %v825_v52, 0.0  ;;  %v873_v63 = vmax.f32 %v841_v53, 0.0  ;;  %v1274_v0 = vpack.c.bf16 %v859_v54, %v858_v50  ;;  %v1314_v1 = vpack.c.bf16 %v875_v55, %v874_v51 }
 0x12e   : > { %v789_v2 = vmul.f32 %v1878_v24, %v568_v58  ;;  %v805_v3 = vmul.f32 %v1878_v24, %v632_v59  ;;  %v1408_v4 = vpop.f32.mrf.mxu0  ;;  %v1424_v5 = vpop.f32.mrf.mxu1  ;;  %v830_v8 = vadd.f32 %v1885_v29, %v791_v56  ;;  %v846_v9 = vadd.f32 %v1885_v29, %v807_v57 }
 0x12f   : > { %v1269_v6 = vpack.c.bf16 %v857_v62, %v856_v60  ;;  %v1309_v7 = vpack.c.bf16 %v873_v63, %v872_v61  ;;  %1346 = vst [vmem:[%s1907_s8 + $0x8] sm:$0xff] %v1274_v0   ;;  %1354 = vst [vmem:[%s1907_s8 + $0x48] sm:$0xff] %v1314_v1   ;;  %v792_v10 = vmul.f32 %v1408_v4, %v1878_v24 }
 0x130   : > { %v808_v11 = vmul.f32 %v1424_v5, %v1878_v24  ;;  %v571_v12 = vpop.f32.mrf.mxu0  ;;  %v635_v13 = vpop.f32.mrf.mxu1  ;;  %v828_v14 = vadd.f32 %v1885_v29, %v789_v2  ;;  %v844_v15 = vadd.f32 %v1885_v29, %v805_v3  ;;  %v862_v27 = vmax.f32 %v830_v8, 0.0 }
 0x131   : > { %1270 = vst [vmem:[%s1907_s8] sm:$0xff] %v1269_v6   ;;  %1353 = vst [vmem:[%s1907_s8 + $0x40] sm:$0xff] %v1309_v7   ;;  %v790_v16 = vmul.f32 %v1878_v24, %v571_v12  ;;  %v806_v17 = vmul.f32 %v1878_v24, %v635_v13  ;;  %v831_v18 = vadd.f32 %v1885_v29, %v792_v10  ;;  %v878_v28 = vmax.f32 %v846_v9, 0.0 }
 0x132   : > { %v847_v19 = vadd.f32 %v1885_v29, %v808_v11  ;;  %v1411_v20 = vpop.f32.mrf.mxu0  ;;  %v1427_v21 = vpop.f32.mrf.mxu1  ;;  %v860_v34 = vmax.f32 %v828_v14, 0.0  ;;  %v876_v35 = vmax.f32 %v844_v15, 0.0 }
 0x133   : > { %v829_v22 = vadd.f32 %v1885_v29, %v790_v16  ;;  %v845_v23 = vadd.f32 %v1885_v29, %v806_v17  ;;  %v795_v25 = vmul.f32 %v1411_v20, %v1878_v24  ;;  %v811_v26 = vmul.f32 %v1427_v21, %v1878_v24 }
 0x134   : > { %v863_v30 = vmax.f32 %v831_v18, 0.0  ;;  %v879_v31 = vmax.f32 %v847_v19, 0.0  ;;  %v584_v32 = vpop.f32.mrf.mxu0  ;;  %v648_v33 = vpop.f32.mrf.mxu1 }
 0x135   : > { %v861_v36 = vmax.f32 %v829_v22, 0.0  ;;  %v877_v37 = vmax.f32 %v845_v23, 0.0  ;;  %v793_v40 = vmul.f32 %v1878_v24, %v584_v32  ;;  %v809_v41 = vmul.f32 %v1878_v24, %v648_v33 }
 0x136   : > { %v1284_v38 = vpack.c.bf16 %v863_v30, %v862_v27  ;;  %v1324_v39 = vpack.c.bf16 %v879_v31, %v878_v28  ;;  %v1412_v42 = vpop.f32.mrf.mxu0  ;;  %v1428_v43 = vpop.f32.mrf.mxu1  ;;  %v834_v46 = vadd.f32 %v1885_v29, %v795_v25  ;;  %v850_v47 = vadd.f32 %v1885_v29, %v811_v26 }
 0x137   : > { %v1279_v44 = vpack.c.bf16 %v861_v36, %v860_v34  ;;  %v1319_v45 = vpack.c.bf16 %v877_v37, %v876_v35  ;;  %v796_v48 = vmul.f32 %v1412_v42, %v1878_v24  ;;  %v812_v49 = vmul.f32 %v1428_v43, %v1878_v24 }
 0x138   : > { %1348 = vst [vmem:[%s1907_s8 + $0x18] sm:$0xff] %v1284_v38   ;;  %1356 = vst [vmem:[%s1907_s8 + $0x58] sm:$0xff] %v1324_v39   ;;  %v587_v50 = vpop.f32.mrf.mxu0  ;;  %v651_v51 = vpop.f32.mrf.mxu1  ;;  %v832_v52 = vadd.f32 %v1885_v29, %v793_v40  ;;  %v848_v53 = vadd.f32 %v1885_v29, %v809_v41  ;;  %v866_v60 = vmax.f32 %v834_v46, 0.0  ;;  %v882_v61 = vmax.f32 %v850_v47, 0.0 }
 0x139   : > { %1347 = vst [vmem:[%s1907_s8 + $0x10] sm:$0xff] %v1279_v44   ;;  %1355 = vst [vmem:[%s1907_s8 + $0x50] sm:$0xff] %v1319_v45   ;;  %v794_v54 = vmul.f32 %v1878_v24, %v587_v50  ;;  %v810_v55 = vmul.f32 %v1878_v24, %v651_v51  ;;  %v835_v56 = vadd.f32 %v1885_v29, %v796_v48 }
 0x13a   : > { %v851_v57 = vadd.f32 %v1885_v29, %v812_v49  ;;  %v1415_v58 = vpop.f32.mrf.mxu0  ;;  %v1431_v59 = vpop.f32.mrf.mxu1  ;;  %v864_v6 = vmax.f32 %v832_v52, 0.0  ;;  %v880_v7 = vmax.f32 %v848_v53, 0.0 }
 0x13b   : > { %v833_v62 = vadd.f32 %v1885_v29, %v794_v54  ;;  %v849_v63 = vadd.f32 %v1885_v29, %v810_v55  ;;  %v867_v0 = vmax.f32 %v835_v56, 0.0  ;;  %v799_v2 = vmul.f32 %v1415_v58, %v1878_v24 }
 0x13c   : > { %v883_v1 = vmax.f32 %v851_v57, 0.0  ;;  %v815_v3 = vmul.f32 %v1431_v59, %v1878_v24  ;;  %v600_v4 = vpop.f32.mrf.mxu0  ;;  %v664_v5 = vpop.f32.mrf.mxu1 }
 0x13d   : > { %v865_v8 = vmax.f32 %v833_v62, 0.0  ;;  %v881_v9 = vmax.f32 %v849_v63, 0.0  ;;  %v1294_v10 = vpack.c.bf16 %v867_v0, %v866_v60  ;;  %v797_v12 = vmul.f32 %v1878_v24, %v600_v4 }
 0x13e   : > { %v1334_v11 = vpack.c.bf16 %v883_v1, %v882_v61  ;;  %v813_v13 = vmul.f32 %v1878_v24, %v664_v5  ;;  %v1416_v14 = vpop.f32.mrf.mxu0  ;;  %v1432_v15 = vpop.f32.mrf.mxu1  ;;  %v838_v18 = vadd.f32 %v1885_v29, %v799_v2  ;;  %v854_v19 = vadd.f32 %v1885_v29, %v815_v3 }
 0x13f   : > { %v1289_v16 = vpack.c.bf16 %v865_v8, %v864_v6  ;;  %v1329_v17 = vpack.c.bf16 %v881_v9, %v880_v7  ;;  %1350 = vst [vmem:[%s1907_s8 + $0x28] sm:$0xff] %v1294_v10   ;;  %v800_v20 = vmul.f32 %v1416_v14, %v1878_v24  ;;  %v816_v21 = vmul.f32 %v1432_v15, %v1878_v24 }
 0x140   : > { %1358 = vst [vmem:[%s1907_s8 + $0x68] sm:$0xff] %v1334_v11   ;;  %v603_v22 = vpop.f32.mrf.mxu0  ;;  %v667_v23 = vpop.f32.mrf.mxu1  ;;  %v836_v25 = vadd.f32 %v1885_v29, %v797_v12  ;;  %v852_v26 = vadd.f32 %v1885_v29, %v813_v13  ;;  %v870_v34 = vmax.f32 %v838_v18, 0.0  ;;  %v886_v35 = vmax.f32 %v854_v19, 0.0 }
 0x141   : > { %1349 = vst [vmem:[%s1907_s8 + $0x20] sm:$0xff] %v1289_v16   ;;  %1357 = vst [vmem:[%s1907_s8 + $0x60] sm:$0xff] %v1329_v17   ;;  %v798_v27 = vmul.f32 %v1878_v24, %v603_v22  ;;  %v814_v28 = vmul.f32 %v1878_v24, %v667_v23  ;;  %v839_v30 = vadd.f32 %v1885_v29, %v800_v20 }
 0x142   : > { %v855_v31 = vadd.f32 %v1885_v29, %v816_v21  ;;  %v868_v24 = vmax.f32 %v836_v25, 0.0  ;;  %v884_v38 = vmax.f32 %v852_v26, 0.0 }
 0x143   : > { %v837_v32 = vadd.f32 %v1885_v29, %v798_v27  ;;  %v853_v33 = vadd.f32 %v1885_v29, %v814_v28  ;;  %v871_v36 = vmax.f32 %v839_v30, 0.0 }
 0x144   : > { %v887_v37 = vmax.f32 %v855_v31, 0.0 }
 0x145   : > { %v869_v39 = vmax.f32 %v837_v32, 0.0  ;;  %v885_v40 = vmax.f32 %v853_v33, 0.0  ;;  %v1304_v41 = vpack.c.bf16 %v871_v36, %v870_v34 }
 0x146   : > { %v1344_v42 = vpack.c.bf16 %v887_v37, %v886_v35 }
 0x147   : > { %v1299_v29 = vpack.c.bf16 %v869_v39, %v868_v24  ;;  %v1339_v43 = vpack.c.bf16 %v885_v40, %v884_v38  ;;  %1352 = vst [vmem:[%s1907_s8 + $0x38] sm:$0xff] %v1304_v41  }
 0x148   : > { %1360 = vst [vmem:[%s1907_s8 + $0x78] sm:$0xff] %v1344_v42  }
 0x149   : > { %1351 = vst [vmem:[%s1907_s8 + $0x30] sm:$0xff] %v1299_v29   ;;  %1359 = vst [vmem:[%s1907_s8 + $0x70] sm:$0xff] %v1339_v43  }
 0x14a   : > { %1617 = shalt.err (!%p1614_p5)
}
 0x14b   : > { %s1618_s30 = scalar_lea.hbm %s1970_s18, 2048  ;;  %s1622_s25 = scalar_lea.hbm %s2028_s4, 4096 }
 0x14c   : > { %p1619_p7 = scmp.ne.s32.totalorder %s1970_s18, %s1618_s30  ;;  %p1623_p9 = scmp.lt.s32.totalorder %s1970_s18, %s2028_s4 }
 0x14d   : > { %p1624_p11 = scmp.lt.s32.totalorder %s1622_s25, %s1618_s30 }
 0x14e   : > { %p1620_p4 = pnand %p1619_p7, %p1812_p13 }
 0x14f   : > { %p1625_p10 = por %p1624_p11, %p1623_p9 }
 0x150   : > { %p1621_p6 = pneg %p1620_p4 }
 0x152   : > { %p1626_p1 = pnand %p1625_p10, %p1621_p6 }
 0x154   : > { %1629 = shalt.err (!%p1626_p1)
}
 0x155   : > { %s1695_s8 = smov 64   ;;  %s1696_s9 = smov 4  }
 0x156   : > { %1455 = dma.vmem_to_hbm [thread:$0]  (%p1812_p13), %s1972_s10, 2048, %s1970_s18, %s1049_s11, %s1695_s8, %s1695_s8, %s1696_s9  }
 0x157 PF: > { %s1077_s24 = sand.u32 1, %s1668_s15   ;;  %p2046_p8 = scmp.ne.s32.totalorder %s2036_s26, 0 }
 0x158   : > { %p2047_p12 = scmp.ge.s32.totalorder %s1688_s20, 2  ;;  %s1078_s14 = scalar_lea.sflag [#allocation5], %s1077_s24 }
 0x15a   : > { %p1466_p0 = pnand %p2047_p12, %p2046_p8 }
 0x15c   : > { %p1467_p2 = pneg %p1466_p0 }
 0x15e   : > { %1663 = dma.done.wait (%p1467_p2), %s1078_s14, 2048  }
 0x15f   : > { %1665 = vsyncadd (%p1467_p2), %s1078_s14, 4294965248  ;;  %s21_s20 = sadd.s32 1, %s1688_s20   ;;  %s2048_s15 = smov %s1672_s16 }
 0x160   : > { %p18_p3 = scmp.ge.s32.totalorder %s21_s20, 4   ;;  %s2049_s16 = smov %s1676_s17 }
 0x161   : > { %s2050_s17 = smov %s1821_s28  ;;  %s2051_s18 = smov %s1684_s19 }
 0x162   : > { %s2052_s19 = smov %s2054_s5  ;;  %20 = sbr.rel (!%p18_p3) target bundleno = 9 (0x9), region = 94 }
 0x167   :  { %1083 = vsyncpa [#allocation4], 1 }
 0x168   :  { %1085 = vsyncpa [#allocation4 + $0x1], 1 }
 0x169   :  { %1086 = vsyncpa [#allocation7], 1 }
 0x16a   :  { %1087 = vsyncpa [#allocation5], 1 }
 0x16b   :  { %1089 = vsyncpa [#allocation5 + $0x1], 1 }

</bundles_post_ra>
